<compile_context>
chip_gen: v6e
topology: v6e:2x2x1
jax: 0.10.0
libtpu: 0.0.40
codegen_flags: <defaults>
</compile_context>

<pallas_src>
import jax
import jax.numpy as jnp
from jax.experimental import pallas as pl
from jax.experimental.pallas import tpu as pltpu


def mlp_kernel(x_ref, w1t_ref, b1_ref, w2t_ref, b2_ref, o_ref):
    x = x_ref[...]        # (B, I)
    w1t = w1t_ref[...]    # (I, H)  pre-transposed
    b1 = b1_ref[...]      # (1, H)
    w2t = w2t_ref[...]    # (H, O)  pre-transposed
    b2 = b2_ref[...]      # (1, O)

    # fc1: x @ W1^T + b1, then ReLU (fused in VMEM — h never touches HBM)
    h = jnp.dot(x, w1t, preferred_element_type=jnp.float32) + b1
    h = jnp.maximum(h, 0.0)

    # out: h @ W2^T + b2
    y = jnp.dot(h, w2t, preferred_element_type=jnp.float32) + b2
    o_ref[...] = y.astype(o_ref.dtype)


def prepare_params(w1, b1, w2, b2):
    """One-time parameter preprocessing (off the per-call path)."""
    w1t = jnp.asarray(w1).T            # (I, H)
    w2t = jnp.asarray(w2).T            # (H, O)
    b1_2d = jnp.asarray(b1).reshape(1, -1)   # (1, H)
    b2_2d = jnp.asarray(b2).reshape(1, -1)   # (1, O)
    return w1t, b1_2d, w2t, b2_2d


@jax.jit
def mlp_forward(x, w1t, b1_2d, w2t, b2_2d):
    B = x.shape[0]
    O = w2t.shape[1]
    # Whole-array blocks: block_shape == array shape, so the (8,128) divisibility
    # rule does not apply and Mosaic masks lanes internally.  No padding, no slicing.
    return pl.pallas_call(
        mlp_kernel,
        out_shape=jax.ShapeDtypeStruct((B, O), x.dtype),
        in_specs=[pl.BlockSpec(memory_space=pltpu.MemorySpace.VMEM) for _ in range(5)],
        out_specs=pl.BlockSpec(memory_space=pltpu.MemorySpace.VMEM),
    )(x, w1t, b1_2d, w2t, b2_2d)


if __name__ == "__main__":
    # Small shapes implied by the module: Linear(input, hidden) -> Linear(hidden, output)
    batch, input_size, hidden_size, output_size = 8, 32, 64, 16

    key = jax.random.PRNGKey(0)
    kx, kw1, kb1, kw2, kb2 = jax.random.split(key, 5)

    x = jax.random.normal(kx, (batch, input_size), dtype=jnp.float32)
    # PyTorch-style uniform(-1/sqrt(fan_in), 1/sqrt(fan_in)) init
    lim1 = 1.0 / (input_size ** 0.5)
    lim2 = 1.0 / (hidden_size ** 0.5)
    w1 = jax.random.uniform(kw1, (hidden_size, input_size), jnp.float32, -lim1, lim1)
    b1 = jax.random.uniform(kb1, (hidden_size,), jnp.float32, -lim1, lim1)
    w2 = jax.random.uniform(kw2, (output_size, hidden_size), jnp.float32, -lim2, lim2)
    b2 = jax.random.uniform(kb2, (output_size,), jnp.float32, -lim2, lim2)

    # One-time weight prep (transposes + bias reshape) — not repeated per forward call.
    w1t, b1_2d, w2t, b2_2d = prepare_params(w1, b1, w2, b2)

    out = mlp_forward(x, w1t, b1_2d, w2t, b2_2d)
    out = jax.block_until_ready(out)

    # Reference check in plain JAX (f32 throughout, so tight tolerance is fine)
    ref = jnp.maximum(x @ w1.T + b1, 0.0) @ w2.T + b2
    assert out.shape == (batch, output_size)
    assert jnp.allclose(out, ref, atol=1e-5, rtol=1e-5)

    print("KERNEL_OK")
</pallas_src>

<mosaic_0001>
module attributes {stable_mosaic.version = 11 : i64} {
  func.func @mlp_kernel(%arg0: memref<8x32xf32, #tpu.memory_space<vmem>>, %arg1: memref<32x64xf32, #tpu.memory_space<vmem>>, %arg2: memref<1x64xf32, #tpu.memory_space<vmem>>, %arg3: memref<64x16xf32, #tpu.memory_space<vmem>>, %arg4: memref<1x16xf32, #tpu.memory_space<vmem>>, %arg5: memref<8x16xf32, #tpu.memory_space<vmem>>) attributes {dimension_semantics = [], scalar_prefetch = 0 : i64, scratch_operands = 0 : i64, tpu.core_type = #tpu.core_type<tc>} {
    %c0 = arith.constant 0 : index
    %c0_0 = arith.constant 0 : index
    %0 = vector.load %arg0[%c0, %c0_0] : memref<8x32xf32, #tpu.memory_space<vmem>>, vector<8x32xf32>
    %c0_1 = arith.constant 0 : index
    %c0_2 = arith.constant 0 : index
    %1 = vector.load %arg1[%c0_1, %c0_2] : memref<32x64xf32, #tpu.memory_space<vmem>>, vector<32x64xf32>
    %c0_3 = arith.constant 0 : index
    %c0_4 = arith.constant 0 : index
    %2 = vector.load %arg2[%c0_3, %c0_4] : memref<1x64xf32, #tpu.memory_space<vmem>>, vector<1x64xf32>
    %c0_5 = arith.constant 0 : index
    %c0_6 = arith.constant 0 : index
    %3 = vector.load %arg3[%c0_5, %c0_6] : memref<64x16xf32, #tpu.memory_space<vmem>>, vector<64x16xf32>
    %c0_7 = arith.constant 0 : index
    %c0_8 = arith.constant 0 : index
    %4 = vector.load %arg4[%c0_7, %c0_8] : memref<1x16xf32, #tpu.memory_space<vmem>>, vector<1x16xf32>
    %cst = arith.constant dense<0.000000e+00> : vector<8x64xf32>
    %5 = tpu.matmul %0, %1, %cst {dimension_numbers = #tpu.dot_dimension_numbers<[1], [0], [0], [1], [0, 0, 1, 1], [], []>} : vector<8x32xf32>, vector<32x64xf32>, vector<8x64xf32> -> vector<8x64xf32>
    %6 = vector.broadcast %2 : vector<1x64xf32> to vector<8x64xf32>
    %7 = arith.addf %5, %6 : vector<8x64xf32>
    %cst_9 = arith.constant 0.000000e+00 : f32
    %8 = vector.broadcast %cst_9 : f32 to vector<8x64xf32>
    %9 = arith.maximumf %7, %8 : vector<8x64xf32>
    %cst_10 = arith.constant dense<0.000000e+00> : vector<8x16xf32>
    %10 = tpu.matmul %9, %3, %cst_10 {dimension_numbers = #tpu.dot_dimension_numbers<[1], [0], [0], [1], [0, 0, 1, 1], [], []>} : vector<8x64xf32>, vector<64x16xf32>, vector<8x16xf32> -> vector<8x16xf32>
    %11 = vector.broadcast %4 : vector<1x16xf32> to vector<8x16xf32>
    %12 = arith.addf %10, %11 : vector<8x16xf32>
    %c0_11 = arith.constant 0 : index
    %c0_12 = arith.constant 0 : index
    %13 = vector.load %arg5[%c0_11, %c0_12] : memref<8x16xf32, #tpu.memory_space<vmem>>, vector<8x16xf32>
    tpu.vector_store %arg5[%c0_11, %c0_12], %12 {strides = array<i32>} : memref<8x16xf32, #tpu.memory_space<vmem>>, vector<8x16xf32>,
    return
  }
}

</mosaic_0001>

<bundles_post_ra>
// kernel: mlp_forward.1
= control target key start
LH: loop header
LB: loop body
LE: loop exit
PB: predicated region body
PF: predicated region fallthrough
CT: control target
= control target key end

     0   :  { %v286_v1 = vmov 0.0   ;;  %vm287_vm0 = vmmov 0   ;;  %s369_s0 = inlined_call_operand.vmem [shape: f32[8,32], index: 0, kind: input, shape index: {}]   ;;  %s370_s1 = inlined_call_operand.vmem [shape: f32[32,64], index: 1, kind: input, shape index: {}]   ;;  %s371_s2 = inlined_call_operand.vmem [shape: f32[1,64], index: 2, kind: input, shape index: {}]   ;;  %s372_s3 = inlined_call_operand.vmem [shape: f32[64,16], index: 3, kind: input, shape index: {}]   ;;  %s373_s4 = inlined_call_operand.vmem [shape: f32[1,16], index: 4, kind: input, shape index: {}]   ;;  %s374_s5 = inlined_call_operand.hbm [shape: f32[8,16], index: 5, kind: output, shape index: {}]  }
   0x1   :  { %v25_v0 = vld [vmem:[%s370_s1 + $0x18] sm:$0xff]  ;;  %231 = vmatprep.subr.mxu0 %v286_v1  ;;  %v24_v2 = vld [vmem:[%s370_s1 + $0x10] sm:$0xff]  ;;  %239 = vmatprep.mubr.msk.f32.mxu0 %vm287_vm0, %v286_v1  ;;  %v23_v5 = vld [vmem:[%s370_s1 + $0x8] sm:$0xff] }
   0x2   :  { %v34_v3 = vld [vmem:[%s372_s3 + $0x38] sm:$0xff]  ;;  %232 = vmatpush3.msra.mxu0 %v25_v0  ;;  %242 = vmatprep.subr.mxu1 %v286_v1  ;;  %v33_v4 = vld [vmem:[%s372_s3 + $0x30] sm:$0xff] }
   0x3   :  { %233 = vmatprep.subr.mxu0 %v286_v1  ;;  %243 = vmatpush3.msra.mxu1 %v34_v3 }
   0x4   :  { %10 = vsyncpa [#allocation3], 0  ;;  %234 = vmatpush3.msra.mxu0 %v24_v2  ;;  %244 = vmatprep.subr.mxu1 %v286_v1  ;;  %v32_v6 = vld [vmem:[%s372_s3 + $0x28] sm:$0xff]  ;;  %v22_v7 = vld [vmem:[%s370_s1] sm:$0xff]  ;;  %vm42_vm1 = vcmask 261120   ;;  %vm123_vm2 = vcmask 523264  }
   0x5   :  { %235 = vmatprep.subr.mxu0 %v286_v1  ;;  %245 = vmatpush3.msra.mxu1 %v33_v4  ;;  %v21_v8 = vld [vmem:[%s369_s0] sm:$0xff]  ;;  %v30_v10 = vld [vmem:[%s372_s3 + $0x18] sm:$0xff]  ;;  %v29_v11 = vld [vmem:[%s372_s3 + $0x10] sm:$0xff]  ;;  %s288_s21 = smov [#allocation2]   ;;  %vm197_vm3 = vcmask 130048  }
   0x6   :  { %236 = vmatpush3.msra.mxu0 %v23_v5  ;;  %246 = vmatprep.subr.mxu1 %v286_v1  ;;  %v31_v9 = vld [vmem:[%s372_s3 + $0x20] sm:$0xff]  ;;  %v28_v12 = vld [vmem:[%s372_s3 + $0x8] sm:$0xff]  ;;  %s205_s22 = sshll.u32 %s288_s21, 4  ;;  %s206_s22 = int_to_ptr.vmem [resolvable:$true] %s205_s22 }
   0x7   :  { %237 = vmatprep.subr.mxu0 %v286_v1  ;;  %247 = vmatpush3.msra.mxu1 %v32_v6  ;;  %v27_v13 = vld [vmem:[%s372_s3] sm:$0xff]  ;;  %s264_s3 = scalar_lea.vmem %s206_s22, 128  ;;  %p269_p1 = scmp.lt.s32.totalorder %s206_s22, %s206_s22 }
   0x8   :  { %238 = vmatpush3.msra.mxu0 %v22_v7  ;;  %248 = vmatprep.subr.mxu1 %v286_v1  ;;  %v213_v14 = vld [vmem:[%s371_s2] ss:$0 sm:$0xff]  ;;  %p265_p0 = scmp.ne.s32.totalorder %s206_s22, %s264_s3  ;;  %p270_p2 = scmp.lt.s32.totalorder %s264_s3, %s264_s3 }
   0x9   :  { %240 = vmatmul.mubr.msk.f32.vlgmr.msra.gmra.mxu0 %vm42_vm1, %v21_v8  ;;  %249 = vmatpush3.msra.mxu1 %v31_v9  ;;  %v215_v19 = vld [vmem:[%s373_s4] ss:$0 sm:$0xff] }
   0xa   :  { %250 = vmatprep.subr.mxu1 %v286_v1  ;;  %258 = vmatprep.mubr.msk.f32.mxu1 %vm287_vm0, %v286_v1  ;;  %p271_p3 = por %p270_p2, %p269_p1 }
   0xb   :  { %251 = vmatpush3.msra.mxu1 %v30_v10 }
   0xc   :  { %252 = vmatprep.subr.mxu1 %v286_v1  ;;  %p272_p4 = pnand %p271_p3, %p265_p0 }
   0xd   :  { %253 = vmatpush3.msra.mxu1 %v29_v11 }
   0xe   :  { %254 = vmatprep.subr.mxu1 %v286_v1 }
   0xf   :  { %255 = vmatpush3.msra.mxu1 %v28_v12 }
  0x10   :  { %256 = vmatprep.subr.mxu1 %v286_v1 }
  0x11   :  { %257 = vmatpush3.msra.mxu1 %v27_v13 }
  0xc9   :  { %v112_v15 = vpop.f32.mrf.mxu0 }
  0xca   :  { %v113_v16 = vadd.f32 %v213_v14, %v112_v15 }
  0xcb   :  { %v241_v17 = vpop.f32.mrf.mxu0 }
  0xcc   :  { %v116_v18 = vmax.f32 %v113_v16, 0.0 }
  0xce   :  { %259 = vmatmul.mubr.msk.f32.vlgmr.msra.gmra.mxu1 %vm123_vm2, %v116_v18 }
 0x18e   :  { %v193_v20 = vpop.f32.mrf.mxu1 }
 0x18f   :  { %v194_v21 = vadd.f32 %v215_v19, %v193_v20 }
 0x190   :  { %v260_v22 = vpop.f32.mrf.mxu1 }
 0x191   :  { %198 = vst.msk [vmem:[#allocation2] sm:$0xff] %vm197_vm3, %v194_v21 }
 0x192   :  { %275 = shalt.err (!%p272_p4)
}
 0x193   :  { %208 = dma.vmem_to_hbm [thread:$0]  %s206_s22, 128, %s374_s5, [#allocation3]  }
 0x194   :  { %284 = dma.done.wait [#allocation3], 128  }
 0x195   :  { %285 = vsyncadd [#allocation3], 4294967168 }
 0x196   :  { %212 = vsyncpa [#allocation3], 1 }

</bundles_post_ra>
